<compile_context>
chip_gen: v7x
topology: tpu7x:2x2x1
jax: 0.10.0
libtpu: 0.0.40
codegen_flags: <defaults>
</compile_context>

<pallas_src>
import functools

import numpy as np
import jax
import jax.numpy as jnp
from jax.experimental import pallas as pl
from jax.experimental.pallas import tpu as pltpu

CRITIC_HIDDEN_LAYER_1 = 256
CRITIC_HIDDEN_LAYER_2 = 128


def _round_up(x, m):
    return ((x + m - 1) // m) * m


# ----------------------------------------------------------------------------
# Kernel: one batch tile of the 3-layer MLP (2 MXU matmuls + VPU epilogues).
# ----------------------------------------------------------------------------
def _critic_kernel(state_ref, action_ref, w1_ref, w2h_ref, slab_ref, out_ref,
                   *, action_num, h2):
    """slab layout (lane-dense (4+A, H1) f32, resident across grid steps):
         row 0        : b1                    (H1)
         row 1        : b2   | zero pad       (H2 | H1-H2)
         row 2        : b3   | zero pad       (1  | H1-1)
         row 3        : w3^T | zero pad       (H2 | H1-H2)
         row 4+j      : W2_a[j] | zero pad    (H2 | H1-H2)   j < action_num
    """
    state = state_ref[...]                       # (TB, S)
    action = action_ref[...]                     # (TB, A)

    b1 = slab_ref[0:1, :]                        # (1, H1)
    b2 = slab_ref[1:2, :h2]                      # (1, H2)
    b3 = slab_ref[2:3, 0:1]                      # (1, 1)
    w3_row = slab_ref[3:4, :h2]                  # (1, H2)

    # fc1 + relu (MXU)
    h1 = jnp.dot(state, w1_ref[...], preferred_element_type=jnp.float32)
    h1 = jnp.maximum(h1 + b1, 0.0)               # (TB, H1)

    # fc2 on concat([h1, action]):
    #   concat([h1, a]) @ W2 == h1 @ W2_h + a @ W2_a
    # h1 part: real (H1 x H2) contraction -> MXU.
    # action part: K=action_num (tiny) -> broadcast FMAs on the VPU instead of
    # an almost-entirely-padding MXU pass.
    acc = jnp.dot(h1, w2h_ref[...], preferred_element_type=jnp.float32) + b2
    for j in range(action_num):                  # static unroll (action_num small)
        acc = acc + action[:, j:j + 1] * slab_ref[4 + j:5 + j, :h2]
    h2_act = jnp.maximum(acc, 0.0)               # (TB, H2)

    # fc3 (out_features == 1): VPU multiply + lane reduction, no 1-wide MXU pass.
    q = jnp.sum(h2_act * w3_row, axis=-1, keepdims=True) + b3
    out_ref[...] = q.astype(out_ref.dtype)       # (TB, 1)


# ----------------------------------------------------------------------------
# Wrapper: packs small params into one slab, tiles the batch, launches Pallas.
# ----------------------------------------------------------------------------
@functools.partial(jax.jit, static_argnames=("block_b",))
def critic_forward(state, action, params, block_b=512):
    w1, b1, w2, b2, w3, b3 = params              # transposed (in, out) weights
    B, S = state.shape
    A = action.shape[1]
    H1 = w1.shape[1]
    H2 = w2.shape[1]

    # Pack the tiny parameters into a single lane-dense slab (one DMA, resident).
    slab = jnp.zeros((4 + A, H1), jnp.float32)
    slab = slab.at[0, :].set(b1)
    slab = slab.at[1, :H2].set(b2)
    slab = slab.at[2, 0].set(b3[0])
    slab = slab.at[3, :H2].set(w3[:, 0])
    slab = slab.at[4:4 + A, :H2].set(w2[H1:, :])   # W2_a (action rows of W2)
    w2h = w2[:H1, :]                               # W2_h (fc1-output rows of W2)

    # Batch tiling: pad to a multiple of the tile (tile rows multiple of 8).
    tb = min(block_b, _round_up(B, 8))
    b_pad = _round_up(B, tb)
    if b_pad != B:
        state = jnp.pad(state, ((0, b_pad - B), (0, 0)))
        action = jnp.pad(action, ((0, b_pad - B), (0, 0)))
    grid = (b_pad // tb,)

    kernel = functools.partial(_critic_kernel, action_num=A, h2=H2)

    out = pl.pallas_call(
        kernel,
        out_shape=jax.ShapeDtypeStruct((b_pad, 1), jnp.float32),
        grid=grid,
        in_specs=[
            pl.BlockSpec((tb, S), lambda i: (i, 0)),        # state   (batch-tiled)
            pl.BlockSpec((tb, A), lambda i: (i, 0)),        # action  (batch-tiled)
            pl.BlockSpec((S, H1), lambda i: (0, 0)),        # W1      (resident)
            pl.BlockSpec((H1, H2), lambda i: (0, 0)),       # W2_h    (resident)
            pl.BlockSpec((4 + A, H1), lambda i: (0, 0)),    # slab    (resident)
        ],
        out_specs=pl.BlockSpec((tb, 1), lambda i: (i, 0)),
        compiler_params=pltpu.CompilerParams(
            dimension_semantics=("parallel",),              # 2x on v7x megacore
        ),
    )(state, action, w1, w2h, slab)

    return out[:B]


# ----------------------------------------------------------------------------
# Deterministic parameter init (mirrors the PyTorch module's reset_parameters;
# weights stored as (in_features, out_features) = nn.Linear.weight transposed).
# ----------------------------------------------------------------------------
def init_params(key, state_num, action_num,
                h1=CRITIC_HIDDEN_LAYER_1, h2=CRITIC_HIDDEN_LAYER_2):
    k1, k2, k3, kb1, kb2, kb3 = jax.random.split(key, 6)

    # hidden_init in the reference uses weight.size()[0] == out_features
    lim1 = 1.0 / np.sqrt(h1)
    lim2 = 1.0 / np.sqrt(h2)

    w1 = jax.random.uniform(k1, (state_num, h1), jnp.float32, -lim1, lim1)
    b1 = jax.random.uniform(kb1, (h1,), jnp.float32, -lim1, lim1)

    w2 = jax.random.uniform(k2, (h1 + action_num, h2), jnp.float32, -lim2, lim2)
    b2 = jax.random.uniform(kb2, (h2,), jnp.float32, -lim2, lim2)

    w3 = jax.random.uniform(k3, (h2, 1), jnp.float32, -0.003, 0.003)
    b3 = jax.random.uniform(kb3, (1,), jnp.float32, -0.003, 0.003)

    return (w1, b1, w2, b2, w3, b3)


# ----------------------------------------------------------------------------
# Plain-JAX reference (mirrors the PyTorch forward exactly).
# ----------------------------------------------------------------------------
def critic_reference(state, action, params):
    w1, b1, w2, b2, w3, b3 = params
    x = jax.nn.relu(state @ w1 + b1)
    x = jax.nn.relu(jnp.concatenate([x, action], axis=1) @ w2 + b2)
    return x @ w3 + b3


if __name__ == "__main__":
    state_num, action_num = 24, 2   # tennis env sizes

    key = jax.random.PRNGKey(0)
    kp, ks, ka, ks2, ka2 = jax.random.split(key, 5)
    params = init_params(kp, state_num, action_num)

    # Small-batch check (single tile).
    batch = 8
    state = jax.random.normal(ks, (batch, state_num), jnp.float32)
    action = jax.random.uniform(ka, (batch, action_num), jnp.float32, -1.0, 1.0)
    q = critic_forward(state, action, params)
    jax.block_until_ready(q)
    q_ref = critic_reference(state, action, params)
    np.testing.assert_allclose(np.asarray(q), np.asarray(q_ref), rtol=1e-5, atol=1e-5)
    assert q.shape == (batch, 1)

    # Larger-batch check: exercises the batch grid (4 tiles) and padding path.
    batch2 = 777
    state2 = jax.random.normal(ks2, (batch2, state_num), jnp.float32)
    action2 = jax.random.uniform(ka2, (batch2, action_num), jnp.float32, -1.0, 1.0)
    q2 = critic_forward(state2, action2, params, block_b=256)
    jax.block_until_ready(q2)
    q2_ref = critic_reference(state2, action2, params)
    np.testing.assert_allclose(np.asarray(q2), np.asarray(q2_ref), rtol=1e-5, atol=1e-5)
    assert q2.shape == (batch2, 1)

    print("KERNEL_OK")
</pallas_src>

<mosaic_0001>
module attributes {stable_mosaic.version = 11 : i64} {
  func.func @_critic_kernel(%arg0: i32, %arg1: memref<8x24xf32, #tpu.memory_space<vmem>>, %arg2: memref<8x2xf32, #tpu.memory_space<vmem>>, %arg3: memref<24x256xf32, #tpu.memory_space<vmem>>, %arg4: memref<256x128xf32, #tpu.memory_space<vmem>>, %arg5: memref<6x256xf32, #tpu.memory_space<vmem>>, %arg6: memref<8x1xf32, #tpu.memory_space<vmem>>) attributes {dimension_semantics = [#tpu.dimension_semantics<parallel>], iteration_bounds = array<i64: 1>, scalar_prefetch = 0 : i64, scratch_operands = 0 : i64, tpu.core_type = #tpu.core_type<tc>, window_params = [{transform_indices = @transform_0, window_bounds = array<i64: 8, 24>}, {transform_indices = @transform_1, window_bounds = array<i64: 8, 2>}, {pipeline_mode = #tpu.pipeline_mode<synchronous>, transform_indices = @transform_2, window_bounds = array<i64: 24, 256>}, {pipeline_mode = #tpu.pipeline_mode<synchronous>, transform_indices = @transform_3, window_bounds = array<i64: 256, 128>}, {pipeline_mode = #tpu.pipeline_mode<synchronous>, transform_indices = @transform_4, window_bounds = array<i64: 6, 256>}, {transform_indices = @transform_5, window_bounds = array<i64: 8, 1>}]} {
    %c0 = arith.constant 0 : index
    %c0_0 = arith.constant 0 : index
    %0 = vector.load %arg1[%c0, %c0_0] : memref<8x24xf32, #tpu.memory_space<vmem>>, vector<8x24xf32>
    %c0_1 = arith.constant 0 : index
    %c0_2 = arith.constant 0 : index
    %1 = vector.load %arg2[%c0_1, %c0_2] : memref<8x2xf32, #tpu.memory_space<vmem>>, vector<8x2xf32>
    %c0_3 = arith.constant 0 : index
    %c0_4 = arith.constant 0 : index
    %2 = vector.load %arg5[%c0_3, %c0_4] : memref<6x256xf32, #tpu.memory_space<vmem>>, vector<1x256xf32>
    %c1 = arith.constant 1 : index
    %c0_5 = arith.constant 0 : index
    %3 = vector.load %arg5[%c1, %c0_5] : memref<6x256xf32, #tpu.memory_space<vmem>>, vector<1x128xf32>
    %c2 = arith.constant 2 : index
    %c0_6 = arith.constant 0 : index
    %4 = vector.load %arg5[%c2, %c0_6] : memref<6x256xf32, #tpu.memory_space<vmem>>, vector<1x1xf32>
    %c3 = arith.constant 3 : index
    %c0_7 = arith.constant 0 : index
    %5 = vector.load %arg5[%c3, %c0_7] : memref<6x256xf32, #tpu.memory_space<vmem>>, vector<1x128xf32>
    %c0_8 = arith.constant 0 : index
    %c0_9 = arith.constant 0 : index
    %6 = vector.load %arg3[%c0_8, %c0_9] : memref<24x256xf32, #tpu.memory_space<vmem>>, vector<24x256xf32>
    %cst = arith.constant dense<0.000000e+00> : vector<8x256xf32>
    %7 = tpu.matmul %0, %6, %cst {dimension_numbers = #tpu.dot_dimension_numbers<[1], [0], [0], [1], [0, 0, 1, 1], [], []>} : vector<8x24xf32>, vector<24x256xf32>, vector<8x256xf32> -> vector<8x256xf32>
    %8 = vector.broadcast %2 : vector<1x256xf32> to vector<8x256xf32>
    %9 = arith.addf %7, %8 : vector<8x256xf32>
    %cst_10 = arith.constant 0.000000e+00 : f32
    %10 = vector.broadcast %cst_10 : f32 to vector<8x256xf32>
    %11 = arith.maximumf %9, %10 : vector<8x256xf32>
    %c0_11 = arith.constant 0 : index
    %c0_12 = arith.constant 0 : index
    %12 = vector.load %arg4[%c0_11, %c0_12] : memref<256x128xf32, #tpu.memory_space<vmem>>, vector<256x128xf32>
    %cst_13 = arith.constant dense<0.000000e+00> : vector<8x128xf32>
    %13 = tpu.matmul %11, %12, %cst_13 {dimension_numbers = #tpu.dot_dimension_numbers<[1], [0], [0], [1], [0, 0, 1, 1], [], []>} : vector<8x256xf32>, vector<256x128xf32>, vector<8x128xf32> -> vector<8x128xf32>
    %14 = vector.broadcast %3 : vector<1x128xf32> to vector<8x128xf32>
    %15 = arith.addf %13, %14 : vector<8x128xf32>
    %16 = vector.extract_strided_slice %1 {offsets = [0, 0], sizes = [8, 1], strides = [1, 1]} : vector<8x2xf32> to vector<8x1xf32>
    %c4 = arith.constant 4 : index
    %c0_14 = arith.constant 0 : index
    %17 = vector.load %arg5[%c4, %c0_14] : memref<6x256xf32, #tpu.memory_space<vmem>>, vector<1x128xf32>
    %18 = vector.broadcast %16 : vector<8x1xf32> to vector<8x128xf32>
    %19 = vector.broadcast %17 : vector<1x128xf32> to vector<8x128xf32>
    %20 = arith.mulf %18, %19 : vector<8x128xf32>
    %21 = arith.addf %15, %20 : vector<8x128xf32>
    %22 = vector.extract_strided_slice %1 {offsets = [0, 1], sizes = [8, 1], strides = [1, 1]} : vector<8x2xf32> to vector<8x1xf32>
    %c5 = arith.constant 5 : index
    %c0_15 = arith.constant 0 : index
    %23 = vector.load %arg5[%c5, %c0_15] : memref<6x256xf32, #tpu.memory_space<vmem>>, vector<1x128xf32>
    %24 = vector.broadcast %22 : vector<8x1xf32> to vector<8x128xf32>
    %25 = vector.broadcast %23 : vector<1x128xf32> to vector<8x128xf32>
    %26 = arith.mulf %24, %25 : vector<8x128xf32>
    %27 = arith.addf %21, %26 : vector<8x128xf32>
    %cst_16 = arith.constant 0.000000e+00 : f32
    %28 = vector.broadcast %cst_16 : f32 to vector<8x128xf32>
    %29 = arith.maximumf %27, %28 : vector<8x128xf32>
    %30 = vector.broadcast %5 : vector<1x128xf32> to vector<8x128xf32>
    %31 = arith.mulf %29, %30 : vector<8x128xf32>
    %cst_17 = arith.constant dense<0.000000e+00> : vector<8xf32>
    %32 = vector.multi_reduction <add>, %31, %cst_17 [1] : vector<8x128xf32> to vector<8xf32>
    %33 = vector.shape_cast %32 : vector<8xf32> to vector<8x1xf32>
    %34 = vector.broadcast %4 : vector<1x1xf32> to vector<8x1xf32>
    %35 = arith.addf %33, %34 : vector<8x1xf32>
    %c0_18 = arith.constant 0 : index
    %c0_19 = arith.constant 0 : index
    %36 = vector.load %arg6[%c0_18, %c0_19] : memref<8x1xf32, #tpu.memory_space<vmem>>, vector<8x1xf32>
    tpu.vector_store %arg6[%c0_18, %c0_19], %35 {strides = array<i32>} : memref<8x1xf32, #tpu.memory_space<vmem>>, vector<8x1xf32>,
    return
  }
  func.func @transform_0(%arg0: i32) -> (i32, i32) {
    %c0_i32 = arith.constant 0 : i32
    %c0_i32_0 = arith.constant 0 : i32
    return %arg0, %c0_i32 : i32, i32
  }
  func.func @transform_1(%arg0: i32) -> (i32, i32) {
    %c0_i32 = arith.constant 0 : i32
    %c0_i32_0 = arith.constant 0 : i32
    return %arg0, %c0_i32 : i32, i32
  }
  func.func @transform_2(%arg0: i32) -> (i32, i32) {
    %c0_i32 = arith.constant 0 : i32
    %c0_i32_0 = arith.constant 0 : i32
    %c0_i32_1 = arith.constant 0 : i32
    return %c0_i32, %c0_i32_0 : i32, i32
  }
  func.func @transform_3(%arg0: i32) -> (i32, i32) {
    %c0_i32 = arith.constant 0 : i32
    %c0_i32_0 = arith.constant 0 : i32
    %c0_i32_1 = arith.constant 0 : i32
    return %c0_i32, %c0_i32_0 : i32, i32
  }
  func.func @transform_4(%arg0: i32) -> (i32, i32) {
    %c0_i32 = arith.constant 0 : i32
    %c0_i32_0 = arith.constant 0 : i32
    %c0_i32_1 = arith.constant 0 : i32
    return %c0_i32, %c0_i32_0 : i32, i32
  }
  func.func @transform_5(%arg0: i32) -> (i32, i32) {
    %c0_i32 = arith.constant 0 : i32
    %c0_i32_0 = arith.constant 0 : i32
    return %arg0, %c0_i32 : i32, i32
  }
}

</mosaic_0001>

<bundles_post_ra>
// kernel: critic_forward.1
= control target key start
LH: loop header
LB: loop body
LE: loop exit
PB: predicated region body
PF: predicated region fallthrough
CT: control target
= control target key end

     0   :  { %v325_v3 = vmov 0.0   ;;  %vm43_vm0 = vcmask 195584   ;;  %v326_v58 = vmov 0   ;;  %v327_v60 = vmov 1   ;;  %s499_s2 = inlined_call_operand.vmem [shape: f32[24,256], index: 2, kind: input, shape index: {}]   ;;  %s500_s3 = inlined_call_operand.vmem [shape: f32[256,128], index: 3, kind: input, shape index: {}]   ;;  %s501_s0 = inlined_call_operand.vmem [shape: f32[8,24], index: 0, kind: input, shape index: {}]   ;;  %s502_s1 = inlined_call_operand.vmem [shape: f32[8,2], index: 1, kind: input, shape index: {}]   ;;  %s503_s4 = inlined_call_operand.vmem [shape: f32[6,256], index: 4, kind: input, shape index: {}]   ;;  %s504_s5 = inlined_call_operand.vmem [shape: f32[8,1], index: 5, kind: output, shape index: {}]  }
   0x1   :  { %v27_v0 = vld [vmem:[%s499_s2 + $0x8] sm:$0xff]  ;;  %v29_v1 = vld [vmem:[%s499_s2 + $0x18] sm:$0xff]  ;;  %v26_v2 = vld [vmem:[%s499_s2] sm:$0xff]  ;;  %111 = vmatprep.mubr.f32.mxu0 %v325_v3  ;;  %323 = vset.pattern.permute.xlu0 %v326_v58  ;;  %v33_v61 = vlaneseq  ;;  %vm242_vm1 = vcmask 7168  }
   0x2   :  { %v284_v4 = vpack.c.bf16 %v29_v1, %v27_v0  ;;  %v28_v5 = vld [vmem:[%s499_s2 + $0x10] sm:$0xff]  ;;  %v31_v7 = vld [vmem:[%s499_s2 + $0x28] sm:$0xff]  ;;  %v136_v8 = vld [vmem:[%s500_s3 + $0x80] sm:$0xff] }
   0x3   :  { %v286_v6 = vpack.c.bf16 %v28_v5, %v26_v2  ;;  %v137_v9 = vld [vmem:[%s500_s3 + $0x88] sm:$0xff]  ;;  %v120_v11 = vld [vmem:[%s500_s3] sm:$0xff]  ;;  %v138_v13 = vld [vmem:[%s500_s3 + $0x90] sm:$0xff]  ;;  %v34_v62 = vshrl.u32 %v33_v61, 7 }
   0x4   :  { %285 = vmatprep.subr.bf16.mxu0 %v284_v4  ;;  %v288_v10 = vpack.c.bf16 %v137_v9, %v136_v8  ;;  %v121_v12 = vld [vmem:[%s500_s3 + $0x8] sm:$0xff]  ;;  %v139_v15 = vld [vmem:[%s500_s3 + $0x98] sm:$0xff]  ;;  %v122_v16 = vld [vmem:[%s500_s3 + $0x10] sm:$0xff] }
   0x5   :  { %287 = vmatpush1.bf16.msra.mxu0 %v286_v6  ;;  %v290_v14 = vpack.c.bf16 %v121_v12, %v120_v11  ;;  %v123_v17 = vld [vmem:[%s500_s3 + $0x18] sm:$0xff]  ;;  %v30_v18 = vld [vmem:[%s499_s2 + $0x20] sm:$0xff]  ;;  %v292_v19 = vpack.c.bf16 %v139_v15, %v138_v13  ;;  %v141_v21 = vld [vmem:[%s500_s3 + $0xa8] sm:$0xff]  ;;  %v35_v63 = vsub.s32 0, %v34_v62  ;;  %v39_v1 = vsub.s32 1, %v34_v62 }
   0x6   :  { %51 = vmatprep.subr.mxu0 %v31_v7  ;;  %289 = vmatprep.subr.bf16.mxu1 %v288_v10  ;;  %v140_v20 = vld [vmem:[%s500_s3 + $0xa0] sm:$0xff]  ;;  %v294_v23 = vpack.c.bf16 %v123_v17, %v122_v16  ;;  %v125_v26 = vld [vmem:[%s500_s3 + $0x28] sm:$0xff]  ;;  %v142_v27 = vld [vmem:[%s500_s3 + $0xb0] sm:$0xff] }
   0x7   :  { %v20_v22 = vld [vmem:[%s501_s0] sm:$0xff]  ;;  %291 = vmatpush3.bf16.msra.mxu1 %v290_v14  ;;  %v296_v24 = vpack.c.bf16 %v141_v21, %v140_v20  ;;  %v143_v28 = vld [vmem:[%s500_s3 + $0xb8] sm:$0xff]  ;;  %v126_v31 = vld [vmem:[%s500_s3 + $0x30] sm:$0xff] }
   0x8   :  { %293 = vmatprep.subr.bf16.mxu1 %v292_v19  ;;  %v124_v25 = vld [vmem:[%s500_s3 + $0x20] sm:$0xff]  ;;  %v300_v30 = vpack.c.bf16 %v143_v28, %v142_v27  ;;  %v127_v32 = vld [vmem:[%s500_s3 + $0x38] sm:$0xff]  ;;  %v145_v34 = vld [vmem:[%s500_s3 + $0xc8] sm:$0xff] }
   0x9   :  { %52 = vmatpush1.msra.mxu0 %v30_v18  ;;  %v298_v29 = vpack.c.bf16 %v125_v26, %v124_v25  ;;  %v144_v33 = vld [vmem:[%s500_s3 + $0xc0] sm:$0xff]  ;;  %v302_v35 = vpack.c.bf16 %v127_v32, %v126_v31  ;;  %v129_v38 = vld [vmem:[%s500_s3 + $0x48] sm:$0xff]  ;;  %v146_v39 = vld [vmem:[%s500_s3 + $0xd0] sm:$0xff] }
   0xa   :  { %248 = vmatmul.mubr.msk.f32.vlgmr.msra.gmra.mrb[0].mxu0 %vm43_vm0, %v20_v22  ;;  %v304_v36 = vpack.c.bf16 %v145_v34, %v144_v33  ;;  %v128_v37 = vld [vmem:[%s500_s3 + $0x40] sm:$0xff]  ;;  %v147_v40 = vld [vmem:[%s500_s3 + $0xd8] sm:$0xff]  ;;  %v130_v43 = vld [vmem:[%s500_s3 + $0x50] sm:$0xff] }
   0xb   :  { %295 = vmatpush3.bf16.msra.mxu1 %v294_v23  ;;  %v306_v41 = vpack.c.bf16 %v129_v38, %v128_v37  ;;  %v308_v42 = vpack.c.bf16 %v147_v40, %v146_v39  ;;  %v131_v44 = vld [vmem:[%s500_s3 + $0x58] sm:$0xff]  ;;  %v148_v45 = vld [vmem:[%s500_s3 + $0xe0] sm:$0xff]  ;;  %v149_v46 = vld [vmem:[%s500_s3 + $0xe8] sm:$0xff] }
   0xc   :  { %297 = vmatprep.subr.bf16.mxu1 %v296_v24  ;;  %v310_v47 = vpack.c.bf16 %v131_v44, %v130_v43  ;;  %v312_v48 = vpack.c.bf16 %v149_v46, %v148_v45  ;;  %v132_v49 = vld [vmem:[%s500_s3 + $0x60] sm:$0xff]  ;;  %v133_v50 = vld [vmem:[%s500_s3 + $0x68] sm:$0xff]  ;;  %v150_v52 = vld [vmem:[%s500_s3 + $0xf0] sm:$0xff] }
   0xd   :  { %v314_v51 = vpack.c.bf16 %v133_v50, %v132_v49  ;;  %v151_v53 = vld [vmem:[%s500_s3 + $0xf8] sm:$0xff]  ;;  %v134_v55 = vld [vmem:[%s500_s3 + $0x70] sm:$0xff]  ;;  %v21_v59 = vld [vmem:[%s502_s1] sm:$0xff] }
   0xe   :  { %v316_v54 = vpack.c.bf16 %v151_v53, %v150_v52  ;;  %v135_v56 = vld [vmem:[%s500_s3 + $0x78] sm:$0xff]  ;;  %225 = vperm.xlu0 %323, %v21_v59   ;;  %v22_v0 = vld [vmem:[%s503_s4] ss:$8 sm:$0x3]  ;;  %v222_v11 = vld [vmem:[%s503_s4 + $0x4] ss:$0 sm:$0xff] }
   0xf   :  { %299 = vmatpush3.bf16.msra.mxu1 %v298_v29  ;;  %v318_v57 = vpack.c.bf16 %v135_v56, %v134_v55  ;;  %v36_v2 = vrot.slane %v22_v0, %v35_v63  ;;  %v40_v3 = vrot.slane %v22_v0, %v39_v1  ;;  %v23_v13 = vld [vmem:[%s503_s4 + $0x1] ss:$0 sm:$0xff]  ;;  %v230_v15 = vld [vmem:[%s503_s4 + $0x5] ss:$0 sm:$0xff]  ;;  %v25_v23 = vld [vmem:[%s503_s4 + $0x3] ss:$0 sm:$0xff] }
  0x10   :  { %301 = vmatprep.subr.bf16.mxu1 %v300_v30  ;;  %v24_v26 = vld [vmem:[%s503_s4 + $0x2] ss:$0 sm:$0xff] }
  0x12   :  { %324 = vset.pattern.permute.xlu0 %v327_v60 }
  0x13   :  { %303 = vmatpush3.bf16.msra.mxu1 %v302_v35  ;;  %232 = vperm.xlu0 %324, %v21_v59  }
  0x14   :  { %305 = vmatprep.subr.bf16.mxu1 %v304_v36 }
  0x17   :  { %307 = vmatpush3.bf16.msra.mxu1 %v306_v41 }
  0x18   :  { %309 = vmatprep.subr.bf16.mxu1 %v308_v42 }
  0x1b   :  { %311 = vmatpush3.bf16.msra.mxu1 %v310_v47 }
  0x1c   :  { %313 = vmatprep.subr.bf16.mxu1 %v312_v48 }
  0x1f   :  { %315 = vmatpush3.bf16.msra.mxu1 %v314_v51 }
  0x20   :  { %317 = vmatprep.subr.bf16.mxu1 %v316_v54 }
  0x23   :  { %319 = vmatpush3.bf16.msra.mxu1 %v318_v57 }
  0x8d   :  { %v226_v10 = vpop.permute.xlu0 %225 }
  0x8e   :  { %v228_v18 = vmul.f32 %v226_v10, %v222_v11 }
  0x92   :  { %v233_v16 = vpop.permute.xlu0 %232 }
  0x93   :  { %v235_v20 = vmul.f32 %v233_v16, %v230_v15 }
  0xdd   :  { %v113_v4 = vpop.f32.mrb[0].mxu0 }
  0xde   :  { %v114_v5 = vadd.f32 %v113_v4, %v36_v2  ;;  %v115_v6 = vpop.f32.mrb[1].mxu0 }
  0xdf   :  { %v116_v7 = vadd.f32 %v115_v6, %v40_v3 }
  0xe0   :  { %v118_v9 = vmax.f32 %v114_v5, 0.0 }
  0xe1   :  { %v119_v8 = vmax.f32 %v116_v7, 0.0 }
  0xe3   :  { %216 = vmatprep.mubr.f32.mxu1 %v119_v8 }
  0xe4   :  { %217 = vmatmul.mubr.f32.vlgmr.msra.gmra.mrb[0].mxu1 %v118_v9 }
 0x1b7   :  { %v281_v12 = vpop.f32.mrb[0].mxu1 }
 0x1b8   :  { %v282_v14 = vpop.f32.mrb[1].mxu1 }
 0x1b9   :  { %v283_v17 = vadd.f32 %v282_v14, %v281_v12 }
 0x1bb   :  { %v219_v19 = vadd.f32 %v283_v17, %v23_v13 }
 0x1bd   :  { %v229_v21 = vadd.f32 %v228_v18, %v219_v19 }
 0x1bf   :  { %v236_v22 = vadd.f32 %v235_v20, %v229_v21 }
 0x1c1   :  { %v237_v24 = vmax.f32 %v236_v22, 0.0 }
 0x1c3   :  { %v238_v25 = vmul.f32 %v237_v24, %v25_v23 }
 0x1c5   :  { %239 = vadd.xlane.f32.xlu1 %v238_v25 }
 0x252   :  { %v240_v27 = vpop.xlane.xlu1 %239 }
 0x253   :  { %v241_v28 = vadd.f32 %v240_v27, %v24_v26 }
 0x255   :  { %243 = vst.msk [vmem:[%s504_s5] sm:$0xff] %vm242_vm1, %v241_v28 }

</bundles_post_ra>
